<compile_context>
chip_gen: v5e
topology: v5e:2x2
jax: 0.10.0
libtpu: 0.0.40
codegen_flags: <defaults>
</compile_context>

<pallas_src>
import numpy as np
import jax
import jax.numpy as jnp
from jax.experimental import pallas as pl
from jax.experimental.pallas import tpu as pltpu


def _fft_loss_kernel(x_ref, t_ref, c_ref, s_ref, psum_ref):
    # x_ref / t_ref : (TB, HW) block of flattened images (TB multiple of 8).
    # c_ref / s_ref : (HW, HW) cos/sin of the 2-D DFT angle matrix (symmetric).
    # psum_ref      : (1, 8, HW) lane-dense partial sums for this grid step.
    diff = x_ref[...].astype(jnp.float32) - t_ref[...].astype(jnp.float32)

    # Re(Y) = diff @ C2D, Im(Y) = -(diff @ S2D); the sign is irrelevant for |Y|.
    re = jnp.dot(diff, c_ref[...], preferred_element_type=jnp.float32)
    im = jnp.dot(diff, s_ref[...], preferred_element_type=jnp.float32)
    mag = jnp.sqrt(re * re + im * im)                        # (TB, HW)

    tb, hw = mag.shape
    # Sublane-group reduction: reshape keeps the lane dim intact, the sum over
    # the leading axis is pure VPU adds over whole vregs (no XLU traffic).
    partial = jnp.sum(mag.reshape(tb // 8, 8, hw), axis=0)   # (8, HW)
    psum_ref[0] = partial


def fft_loss(output, target):
    """Pallas equivalent of FFTLoss.forward(output, target) -> scalar float32."""
    B, C, H, W = output.shape
    bc = B * C
    HW = H * W

    # ---- block sizing: batch many images per step, keep VMEM modest --------
    TB = min(512, ((bc + 7) // 8) * 8)                       # multiple of 8
    max_tb_by_vmem = max(8, ((2 * 1024 * 1024) // (HW * 4)) // 8 * 8)
    TB = max(8, min(TB, max_tb_by_vmem))
    padded_bc = ((bc + TB - 1) // TB) * TB
    num_blocks = padded_bc // TB

    x2 = output.reshape(bc, HW)
    t2 = target.reshape(bc, HW)
    if padded_bc != bc:
        pad = padded_bc - bc
        x2 = jnp.pad(x2, ((0, pad), (0, 0)))
        t2 = jnp.pad(t2, ((0, pad), (0, 0)))

    # ---- precomputed Kronecker 2-D DFT matrices (host-side NumPy glue) -----
    # p = u*W + v (flattened output index), q = h*W + w (flattened input index)
    # angle A[p, q] = 2*pi*(u*h/H + v*w/W);  F2D = cos(A) - i*sin(A), symmetric.
    uidx = np.repeat(np.arange(H), W)
    vidx = np.tile(np.arange(W), H)
    ang = 2.0 * np.pi * (np.outer(uidx, uidx) / H + np.outer(vidx, vidx) / W)
    c2d = jnp.asarray(np.cos(ang), jnp.float32)              # (HW, HW)
    s2d = jnp.asarray(np.sin(ang), jnp.float32)              # (HW, HW)
    # TODO(synk): for large H*W the (HW, HW) Kronecker matrices no longer fit
    # VMEM; a separate row/column DFT (two matmul passes) would be needed there.

    img_spec = pl.BlockSpec((TB, HW), lambda i: (i, 0))
    mat_spec = pl.BlockSpec((HW, HW), lambda i: (0, 0))

    partials = pl.pallas_call(
        _fft_loss_kernel,
        out_shape=jax.ShapeDtypeStruct((num_blocks, 8, HW), jnp.float32),
        grid=(num_blocks,),
        in_specs=[img_spec, img_spec, mat_spec, mat_spec],
        out_specs=pl.BlockSpec((1, 8, HW), lambda i: (i, 0, 0)),
        compiler_params=pltpu.CompilerParams(
            dimension_semantics=("parallel",)),               # no cross-step state
    )(x2, t2, c2d, s2d)

    # Tiny final reduction + mean over the *true* element count (pad rows are 0).
    return jnp.sum(partials) / jnp.float32(bc * H * W)


if __name__ == "__main__":
    key = jax.random.PRNGKey(0)
    k1, k2 = jax.random.split(key)
    B, C, H, W = 2, 4, 16, 16
    output = jax.random.normal(k1, (B, C, H, W), dtype=jnp.float32)
    target = jax.random.normal(k2, (B, C, H, W), dtype=jnp.float32)

    loss = jax.block_until_ready(jax.jit(fft_loss)(output, target))

    # Reference (plain JAX) check of the PyTorch semantics.
    ref = jnp.mean(jnp.abs(jnp.fft.fft2(output) - jnp.fft.fft2(target)))
    ref = jax.block_until_ready(ref)
    assert np.allclose(np.asarray(loss), np.asarray(ref), rtol=1e-2, atol=1e-3), (
        loss, ref)

    print("KERNEL_OK")
</pallas_src>

<mosaic_0001>
module attributes {stable_mosaic.version = 11 : i64} {
  func.func @_fft_loss_kernel(%arg0: i32, %arg1: memref<8x256xf32, #tpu.memory_space<vmem>>, %arg2: memref<8x256xf32, #tpu.memory_space<vmem>>, %arg3: memref<256x256xf32, #tpu.memory_space<vmem>>, %arg4: memref<256x256xf32, #tpu.memory_space<vmem>>, %arg5: memref<1x8x256xf32, #tpu.memory_space<vmem>>) attributes {dimension_semantics = [#tpu.dimension_semantics<parallel>], iteration_bounds = array<i64: 1>, scalar_prefetch = 0 : i64, scratch_operands = 0 : i64, tpu.core_type = #tpu.core_type<tc>, window_params = [{transform_indices = @transform_0, window_bounds = array<i64: 8, 256>}, {transform_indices = @transform_1, window_bounds = array<i64: 8, 256>}, {pipeline_mode = #tpu.pipeline_mode<synchronous>, transform_indices = @transform_2, window_bounds = array<i64: 256, 256>}, {pipeline_mode = #tpu.pipeline_mode<synchronous>, transform_indices = @transform_3, window_bounds = array<i64: 256, 256>}, {transform_indices = @transform_4, window_bounds = array<i64: 1, 8, 256>}]} {
    %c0 = arith.constant 0 : index
    %c0_0 = arith.constant 0 : index
    %0 = vector.load %arg1[%c0, %c0_0] : memref<8x256xf32, #tpu.memory_space<vmem>>, vector<8x256xf32>
    %c0_1 = arith.constant 0 : index
    %c0_2 = arith.constant 0 : index
    %1 = vector.load %arg2[%c0_1, %c0_2] : memref<8x256xf32, #tpu.memory_space<vmem>>, vector<8x256xf32>
    %2 = arith.subf %0, %1 : vector<8x256xf32>
    %c0_3 = arith.constant 0 : index
    %c0_4 = arith.constant 0 : index
    %3 = vector.load %arg3[%c0_3, %c0_4] : memref<256x256xf32, #tpu.memory_space<vmem>>, vector<256x256xf32>
    %cst = arith.constant dense<0.000000e+00> : vector<8x256xf32>
    %4 = tpu.matmul %2, %3, %cst {dimension_numbers = #tpu.dot_dimension_numbers<[1], [0], [0], [1], [0, 0, 1, 1], [], []>} : vector<8x256xf32>, vector<256x256xf32>, vector<8x256xf32> -> vector<8x256xf32>
    %c0_5 = arith.constant 0 : index
    %c0_6 = arith.constant 0 : index
    %5 = vector.load %arg4[%c0_5, %c0_6] : memref<256x256xf32, #tpu.memory_space<vmem>>, vector<256x256xf32>
    %cst_7 = arith.constant dense<0.000000e+00> : vector<8x256xf32>
    %6 = tpu.matmul %2, %5, %cst_7 {dimension_numbers = #tpu.dot_dimension_numbers<[1], [0], [0], [1], [0, 0, 1, 1], [], []>} : vector<8x256xf32>, vector<256x256xf32>, vector<8x256xf32> -> vector<8x256xf32>
    %7 = arith.mulf %4, %4 : vector<8x256xf32>
    %8 = arith.mulf %6, %6 : vector<8x256xf32>
    %9 = arith.addf %7, %8 : vector<8x256xf32>
    %10 = math.sqrt %9 : vector<8x256xf32>
    %11 = vector.shape_cast %10 : vector<8x256xf32> to vector<1x8x256xf32>
    %cst_8 = arith.constant dense<0.000000e+00> : vector<8x256xf32>
    %12 = vector.multi_reduction <add>, %11, %cst_8 [0] : vector<1x8x256xf32> to vector<8x256xf32>
    %c0_9 = arith.constant 0 : index
    %c0_10 = arith.constant 0 : index
    %c0_11 = arith.constant 0 : index
    %13 = vector.load %arg5[%c0_9, %c0_10, %c0_11] : memref<1x8x256xf32, #tpu.memory_space<vmem>>, vector<1x8x256xf32>
    %14 = vector.shape_cast %13 : vector<1x8x256xf32> to vector<8x256xf32>
    %15 = vector.shape_cast %12 : vector<8x256xf32> to vector<1x8x256xf32>
    tpu.vector_store %arg5[%c0_9, %c0_10, %c0_11], %15 {strides = array<i32>} : memref<1x8x256xf32, #tpu.memory_space<vmem>>, vector<1x8x256xf32>,
    return
  }
  func.func @transform_0(%arg0: i32) -> (i32, i32) {
    %c0_i32 = arith.constant 0 : i32
    %c0_i32_0 = arith.constant 0 : i32
    return %arg0, %c0_i32 : i32, i32
  }
  func.func @transform_1(%arg0: i32) -> (i32, i32) {
    %c0_i32 = arith.constant 0 : i32
    %c0_i32_0 = arith.constant 0 : i32
    return %arg0, %c0_i32 : i32, i32
  }
  func.func @transform_2(%arg0: i32) -> (i32, i32) {
    %c0_i32 = arith.constant 0 : i32
    %c0_i32_0 = arith.constant 0 : i32
    %c0_i32_1 = arith.constant 0 : i32
    return %c0_i32, %c0_i32_0 : i32, i32
  }
  func.func @transform_3(%arg0: i32) -> (i32, i32) {
    %c0_i32 = arith.constant 0 : i32
    %c0_i32_0 = arith.constant 0 : i32
    %c0_i32_1 = arith.constant 0 : i32
    return %c0_i32, %c0_i32_0 : i32, i32
  }
  func.func @transform_4(%arg0: i32) -> (i32, i32, i32) {
    %c0_i32 = arith.constant 0 : i32
    %c0_i32_0 = arith.constant 0 : i32
    %c0_i32_1 = arith.constant 0 : i32
    return %arg0, %c0_i32, %c0_i32_0 : i32, i32, i32
  }
}

</mosaic_0001>

<bundles_post_ra>
// kernel: fft_loss.1
= control target key start
LH: loop header
LB: loop body
LE: loop exit
PB: predicated region body
PF: predicated region fallthrough
CT: control target
= control target key end

     0   :  { %9 = vsyncpa [#allocation3], 0  ;;  %s496_s0 = inlined_call_operand.vmem [shape: f32[8,256], index: 0, kind: input, shape index: {}]   ;;  %s497_s1 = inlined_call_operand.vmem [shape: f32[8,256], index: 1, kind: input, shape index: {}]   ;;  %s498_s2 = inlined_call_operand.hbm [shape: f32[256,256], index: 2, kind: input, shape index: {}]   ;;  %s499_s3 = inlined_call_operand.hbm [shape: f32[256,256], index: 3, kind: input, shape index: {}]   ;;  %s500_s4 = inlined_call_operand.vmem [shape: f32[1,8,256], index: 4, kind: output, shape index: {}]  }
   0x1   :  { %s19_s17 = sshll.u32 %s498_s2, 4  ;;  %s20_s17 = int_to_ptr.hbm [resolvable:$true] %s19_s17 }
   0x2   :  { %10 = vsyncpa [#allocation5], 0  ;;  %s443_s18 = smov [#allocation2]   ;;  %s32_s22 = sshll.u32 %s499_s3, 4  ;;  %s33_s22 = int_to_ptr.hbm [resolvable:$true] %s32_s22 }
   0x3   :  { %s21_s19 = sshll.u32 %s443_s18, 4  ;;  %s444_s23 = smov 256   ;;  %s22_s19 = int_to_ptr.vmem [resolvable:$true] %s21_s19 }
   0x4   :  { %s445_s24 = smov 16   ;;  %s446_s25 = smov [#allocation4]  }
   0x5   :  { %27 = dma.hbm_to_vmem [thread:$0]  %s20_s17, 8192, %s22_s19, [#allocation3], %s444_s23, %s444_s23, %s445_s24  }
   0x6   :  { %s34_s26 = sshll.u32 %s446_s25, 4  ;;  %s35_s26 = int_to_ptr.vmem [resolvable:$true] %s34_s26 }
   0x7   :  { %40 = dma.hbm_to_vmem [thread:$0]  %s33_s22, 8192, %s35_s26, [#allocation5], %s444_s23, %s444_s23, %s445_s24  }
   0x8   :  { %439 = dma.done.wait [#allocation3], 8192  }
   0x9   :  { %440 = vsyncadd [#allocation3], 4294959104 }
   0xa   :  { %441 = dma.done.wait [#allocation5], 8192  }
   0xb   :  { %442 = vsyncadd [#allocation5], 4294959104  ;;  %v85_v0 = vld [vmem:[#allocation2 + $0xf0] sm:$0xff]  ;;  %v86_v2 = vld [vmem:[#allocation2 + $0xf8] sm:$0xff] }
   0xc   :  { %v117_v1 = vld [vmem:[#allocation2 + $0x1f0] sm:$0xff]  ;;  %119 = vmatpush.msra.mxu0 %v85_v0  ;;  %v118_v3 = vld [vmem:[#allocation2 + $0x1f8] sm:$0xff]  ;;  %v83_v4 = vld [vmem:[#allocation2 + $0xe0] sm:$0xff]  ;;  %159 = vmatpush.msra.mxu2 %v86_v2 }
   0xd   :  { %139 = vmatpush.msra.mxu1 %v117_v1  ;;  %v115_v5 = vld [vmem:[#allocation2 + $0x1e0] sm:$0xff]  ;;  %179 = vmatpush.msra.mxu3 %v118_v3  ;;  %v84_v6 = vld [vmem:[#allocation2 + $0xe8] sm:$0xff]  ;;  %v81_v8 = vld [vmem:[#allocation2 + $0xd0] sm:$0xff] }
   0xe   :  { %v116_v7 = vld [vmem:[#allocation2 + $0x1e8] sm:$0xff]  ;;  %120 = vmatpush.msra.mxu0 %v83_v4  ;;  %v113_v9 = vld [vmem:[#allocation2 + $0x1d0] sm:$0xff]  ;;  %v82_v10 = vld [vmem:[#allocation2 + $0xd8] sm:$0xff]  ;;  %160 = vmatpush.msra.mxu2 %v84_v6 }
   0xf   :  { %140 = vmatpush.msra.mxu1 %v115_v5  ;;  %v114_v11 = vld [vmem:[#allocation2 + $0x1d8] sm:$0xff]  ;;  %180 = vmatpush.msra.mxu3 %v116_v7  ;;  %v79_v12 = vld [vmem:[#allocation2 + $0xc0] sm:$0xff]  ;;  %v80_v14 = vld [vmem:[#allocation2 + $0xc8] sm:$0xff] }
  0x10   :  { %v111_v13 = vld [vmem:[#allocation2 + $0x1c0] sm:$0xff]  ;;  %121 = vmatpush.msra.mxu0 %v81_v8  ;;  %v112_v15 = vld [vmem:[#allocation2 + $0x1c8] sm:$0xff]  ;;  %161 = vmatpush.msra.mxu2 %v82_v10  ;;  %v77_v16 = vld [vmem:[#allocation2 + $0xb0] sm:$0xff] }
  0x11   :  { %141 = vmatpush.msra.mxu1 %v113_v9  ;;  %181 = vmatpush.msra.mxu3 %v114_v11  ;;  %v109_v17 = vld [vmem:[#allocation2 + $0x1b0] sm:$0xff]  ;;  %v78_v18 = vld [vmem:[#allocation2 + $0xb8] sm:$0xff]  ;;  %v75_v20 = vld [vmem:[#allocation2 + $0xa0] sm:$0xff] }
  0x12   :  { %122 = vmatpush.msra.mxu0 %v79_v12  ;;  %v110_v19 = vld [vmem:[#allocation2 + $0x1b8] sm:$0xff]  ;;  %162 = vmatpush.msra.mxu2 %v80_v14  ;;  %v107_v21 = vld [vmem:[#allocation2 + $0x1a0] sm:$0xff]  ;;  %v76_v22 = vld [vmem:[#allocation2 + $0xa8] sm:$0xff] }
  0x13   :  { %142 = vmatpush.msra.mxu1 %v111_v13  ;;  %182 = vmatpush.msra.mxu3 %v112_v15  ;;  %v108_v23 = vld [vmem:[#allocation2 + $0x1a8] sm:$0xff]  ;;  %v73_v24 = vld [vmem:[#allocation2 + $0x90] sm:$0xff]  ;;  %v74_v26 = vld [vmem:[#allocation2 + $0x98] sm:$0xff] }
  0x14   :  { %123 = vmatpush.msra.mxu0 %v77_v16  ;;  %163 = vmatpush.msra.mxu2 %v78_v18  ;;  %v105_v25 = vld [vmem:[#allocation2 + $0x190] sm:$0xff]  ;;  %v106_v27 = vld [vmem:[#allocation2 + $0x198] sm:$0xff]  ;;  %v71_v28 = vld [vmem:[#allocation2 + $0x80] sm:$0xff] }
  0x15   :  { %143 = vmatpush.msra.mxu1 %v109_v17  ;;  %183 = vmatpush.msra.mxu3 %v110_v19  ;;  %v103_v29 = vld [vmem:[#allocation2 + $0x180] sm:$0xff]  ;;  %v72_v30 = vld [vmem:[#allocation2 + $0x88] sm:$0xff]  ;;  %v69_v32 = vld [vmem:[#allocation2 + $0x70] sm:$0xff] }
  0x16   :  { %124 = vmatpush.msra.mxu0 %v75_v20  ;;  %164 = vmatpush.msra.mxu2 %v76_v22  ;;  %v104_v31 = vld [vmem:[#allocation2 + $0x188] sm:$0xff]  ;;  %v101_v33 = vld [vmem:[#allocation2 + $0x170] sm:$0xff]  ;;  %v70_v34 = vld [vmem:[#allocation2 + $0x78] sm:$0xff] }
  0x17   :  { %144 = vmatpush.msra.mxu1 %v107_v21  ;;  %184 = vmatpush.msra.mxu3 %v108_v23  ;;  %v102_v35 = vld [vmem:[#allocation2 + $0x178] sm:$0xff]  ;;  %v67_v36 = vld [vmem:[#allocation2 + $0x60] sm:$0xff]  ;;  %v68_v38 = vld [vmem:[#allocation2 + $0x68] sm:$0xff] }
  0x18   :  { %125 = vmatpush.msra.mxu0 %v73_v24  ;;  %165 = vmatpush.msra.mxu2 %v74_v26  ;;  %v99_v37 = vld [vmem:[#allocation2 + $0x160] sm:$0xff]  ;;  %v100_v39 = vld [vmem:[#allocation2 + $0x168] sm:$0xff]  ;;  %v65_v40 = vld [vmem:[#allocation2 + $0x50] sm:$0xff] }
  0x19   :  { %145 = vmatpush.msra.mxu1 %v105_v25  ;;  %185 = vmatpush.msra.mxu3 %v106_v27  ;;  %v97_v41 = vld [vmem:[#allocation2 + $0x150] sm:$0xff]  ;;  %v66_v42 = vld [vmem:[#allocation2 + $0x58] sm:$0xff]  ;;  %v63_v44 = vld [vmem:[#allocation2 + $0x40] sm:$0xff] }
  0x1a   :  { %126 = vmatpush.msra.mxu0 %v71_v28  ;;  %166 = vmatpush.msra.mxu2 %v72_v30  ;;  %v98_v43 = vld [vmem:[#allocation2 + $0x158] sm:$0xff]  ;;  %v95_v45 = vld [vmem:[#allocation2 + $0x140] sm:$0xff]  ;;  %v64_v46 = vld [vmem:[#allocation2 + $0x48] sm:$0xff] }
  0x1b   :  { %146 = vmatpush.msra.mxu1 %v103_v29  ;;  %186 = vmatpush.msra.mxu3 %v104_v31  ;;  %v96_v47 = vld [vmem:[#allocation2 + $0x148] sm:$0xff]  ;;  %v61_v48 = vld [vmem:[#allocation2 + $0x30] sm:$0xff]  ;;  %v62_v50 = vld [vmem:[#allocation2 + $0x38] sm:$0xff] }
  0x1c   :  { %127 = vmatpush.msra.mxu0 %v69_v32  ;;  %167 = vmatpush.msra.mxu2 %v70_v34  ;;  %v93_v49 = vld [vmem:[#allocation2 + $0x130] sm:$0xff]  ;;  %v94_v51 = vld [vmem:[#allocation2 + $0x138] sm:$0xff]  ;;  %v59_v52 = vld [vmem:[#allocation2 + $0x20] sm:$0xff] }
  0x1d   :  { %147 = vmatpush.msra.mxu1 %v101_v33  ;;  %187 = vmatpush.msra.mxu3 %v102_v35  ;;  %v91_v53 = vld [vmem:[#allocation2 + $0x120] sm:$0xff]  ;;  %v60_v54 = vld [vmem:[#allocation2 + $0x28] sm:$0xff]  ;;  %v57_v56 = vld [vmem:[#allocation2 + $0x10] sm:$0xff] }
  0x1e   :  { %128 = vmatpush.msra.mxu0 %v67_v36  ;;  %168 = vmatpush.msra.mxu2 %v68_v38  ;;  %v92_v55 = vld [vmem:[#allocation2 + $0x128] sm:$0xff]  ;;  %v89_v57 = vld [vmem:[#allocation2 + $0x110] sm:$0xff]  ;;  %v58_v58 = vld [vmem:[#allocation2 + $0x18] sm:$0xff] }
  0x1f   :  { %148 = vmatpush.msra.mxu1 %v99_v37  ;;  %188 = vmatpush.msra.mxu3 %v100_v39  ;;  %v90_v59 = vld [vmem:[#allocation2 + $0x118] sm:$0xff]  ;;  %v55_v60 = vld [vmem:[#allocation2] sm:$0xff]  ;;  %v56_v62 = vld [vmem:[#allocation2 + $0x8] sm:$0xff] }
  0x20   :  { %129 = vmatpush.msra.mxu0 %v65_v40  ;;  %169 = vmatpush.msra.mxu2 %v66_v42  ;;  %v87_v61 = vld [vmem:[#allocation2 + $0x100] sm:$0xff]  ;;  %v88_v63 = vld [vmem:[#allocation2 + $0x108] sm:$0xff]  ;;  %v229_v0 = vld [vmem:[#allocation4 + $0xf0] sm:$0xff] }
  0x21   :  { %149 = vmatpush.msra.mxu1 %v97_v41  ;;  %189 = vmatpush.msra.mxu3 %v98_v43  ;;  %v261_v1 = vld [vmem:[#allocation4 + $0x1f0] sm:$0xff]  ;;  %v230_v2 = vld [vmem:[#allocation4 + $0xf8] sm:$0xff]  ;;  %v227_v4 = vld [vmem:[#allocation4 + $0xe0] sm:$0xff] }
  0x22   :  { %130 = vmatpush.msra.mxu0 %v63_v44  ;;  %170 = vmatpush.msra.mxu2 %v64_v46  ;;  %v262_v3 = vld [vmem:[#allocation4 + $0x1f8] sm:$0xff]  ;;  %v259_v5 = vld [vmem:[#allocation4 + $0x1e0] sm:$0xff]  ;;  %v228_v6 = vld [vmem:[#allocation4 + $0xe8] sm:$0xff] }
  0x23   :  { %150 = vmatpush.msra.mxu1 %v95_v45  ;;  %190 = vmatpush.msra.mxu3 %v96_v47  ;;  %v260_v7 = vld [vmem:[#allocation4 + $0x1e8] sm:$0xff]  ;;  %v225_v8 = vld [vmem:[#allocation4 + $0xd0] sm:$0xff]  ;;  %v226_v10 = vld [vmem:[#allocation4 + $0xd8] sm:$0xff] }
  0x24   :  { %131 = vmatpush.msra.mxu0 %v61_v48  ;;  %171 = vmatpush.msra.mxu2 %v62_v50  ;;  %v257_v9 = vld [vmem:[#allocation4 + $0x1d0] sm:$0xff]  ;;  %v258_v11 = vld [vmem:[#allocation4 + $0x1d8] sm:$0xff]  ;;  %v223_v12 = vld [vmem:[#allocation4 + $0xc0] sm:$0xff] }
  0x25   :  { %151 = vmatpush.msra.mxu1 %v93_v49  ;;  %191 = vmatpush.msra.mxu3 %v94_v51  ;;  %v255_v13 = vld [vmem:[#allocation4 + $0x1c0] sm:$0xff]  ;;  %v224_v14 = vld [vmem:[#allocation4 + $0xc8] sm:$0xff]  ;;  %v221_v16 = vld [vmem:[#allocation4 + $0xb0] sm:$0xff] }
  0x26   :  { %132 = vmatpush.msra.mxu0 %v59_v52  ;;  %172 = vmatpush.msra.mxu2 %v60_v54  ;;  %v256_v15 = vld [vmem:[#allocation4 + $0x1c8] sm:$0xff]  ;;  %v253_v17 = vld [vmem:[#allocation4 + $0x1b0] sm:$0xff]  ;;  %v222_v18 = vld [vmem:[#allocation4 + $0xb8] sm:$0xff] }
  0x27   :  { %152 = vmatpush.msra.mxu1 %v91_v53  ;;  %192 = vmatpush.msra.mxu3 %v92_v55  ;;  %v254_v19 = vld [vmem:[#allocation4 + $0x1b8] sm:$0xff]  ;;  %v219_v20 = vld [vmem:[#allocation4 + $0xa0] sm:$0xff]  ;;  %v220_v22 = vld [vmem:[#allocation4 + $0xa8] sm:$0xff] }
  0x28   :  { %133 = vmatpush.msra.mxu0 %v57_v56  ;;  %173 = vmatpush.msra.mxu2 %v58_v58  ;;  %v251_v21 = vld [vmem:[#allocation4 + $0x1a0] sm:$0xff]  ;;  %v252_v23 = vld [vmem:[#allocation4 + $0x1a8] sm:$0xff]  ;;  %v217_v24 = vld [vmem:[#allocation4 + $0x90] sm:$0xff] }
  0x29   :  { %153 = vmatpush.msra.mxu1 %v89_v57  ;;  %193 = vmatpush.msra.mxu3 %v90_v59  ;;  %v249_v25 = vld [vmem:[#allocation4 + $0x190] sm:$0xff]  ;;  %v218_v26 = vld [vmem:[#allocation4 + $0x98] sm:$0xff]  ;;  %v215_v28 = vld [vmem:[#allocation4 + $0x80] sm:$0xff] }
  0x2a   :  { %134 = vmatpush.msra.mxu0 %v55_v60  ;;  %174 = vmatpush.msra.mxu2 %v56_v62  ;;  %v250_v27 = vld [vmem:[#allocation4 + $0x198] sm:$0xff]  ;;  %v247_v29 = vld [vmem:[#allocation4 + $0x180] sm:$0xff]  ;;  %v216_v30 = vld [vmem:[#allocation4 + $0x88] sm:$0xff] }
  0x2b   :  { %154 = vmatpush.msra.mxu1 %v87_v61  ;;  %194 = vmatpush.msra.mxu3 %v88_v63  ;;  %v248_v31 = vld [vmem:[#allocation4 + $0x188] sm:$0xff]  ;;  %v213_v32 = vld [vmem:[#allocation4 + $0x70] sm:$0xff]  ;;  %v214_v34 = vld [vmem:[#allocation4 + $0x78] sm:$0xff] }
  0x2c   :  { %263 = vmatpush.msrb.mxu0 %v229_v0  ;;  %303 = vmatpush.msrb.mxu2 %v230_v2  ;;  %v245_v33 = vld [vmem:[#allocation4 + $0x170] sm:$0xff]  ;;  %v246_v35 = vld [vmem:[#allocation4 + $0x178] sm:$0xff]  ;;  %v211_v36 = vld [vmem:[#allocation4 + $0x60] sm:$0xff] }
  0x2d   :  { %283 = vmatpush.msrb.mxu1 %v261_v1  ;;  %323 = vmatpush.msrb.mxu3 %v262_v3  ;;  %v243_v37 = vld [vmem:[#allocation4 + $0x160] sm:$0xff]  ;;  %v212_v38 = vld [vmem:[#allocation4 + $0x68] sm:$0xff]  ;;  %v209_v40 = vld [vmem:[#allocation4 + $0x50] sm:$0xff] }
  0x2e   :  { %264 = vmatpush.msrb.mxu0 %v227_v4  ;;  %304 = vmatpush.msrb.mxu2 %v228_v6  ;;  %v244_v39 = vld [vmem:[#allocation4 + $0x168] sm:$0xff]  ;;  %v241_v41 = vld [vmem:[#allocation4 + $0x150] sm:$0xff]  ;;  %v49_v42 = vld [vmem:[%s496_s0] sm:$0xff] }
  0x2f   :  { %284 = vmatpush.msrb.mxu1 %v259_v5  ;;  %324 = vmatpush.msrb.mxu3 %v260_v7  ;;  %v51_v43 = vld [vmem:[%s497_s1] sm:$0xff]  ;;  %v50_v44 = vld [vmem:[%s496_s0 + $0x8] sm:$0xff]  ;;  %v210_v46 = vld [vmem:[#allocation4 + $0x58] sm:$0xff] }
  0x30   :  { %265 = vmatpush.msrb.mxu0 %v225_v8  ;;  %305 = vmatpush.msrb.mxu2 %v226_v10  ;;  %v52_v45 = vld [vmem:[%s497_s1 + $0x8] sm:$0xff]  ;;  %v242_v47 = vld [vmem:[#allocation4 + $0x158] sm:$0xff]  ;;  %v207_v48 = vld [vmem:[#allocation4 + $0x40] sm:$0xff]  ;;  %v53_v52 = vsub.f32 %v49_v42, %v51_v43 }
  0x31   :  { %285 = vmatpush.msrb.mxu1 %v257_v9  ;;  %325 = vmatpush.msrb.mxu3 %v258_v11  ;;  %v239_v49 = vld [vmem:[#allocation4 + $0x140] sm:$0xff]  ;;  %v208_v50 = vld [vmem:[#allocation4 + $0x48] sm:$0xff]  ;;  %v54_v53 = vsub.f32 %v50_v44, %v52_v45  ;;  %v205_v54 = vld [vmem:[#allocation4 + $0x30] sm:$0xff] }
  0x32   :  { %266 = vmatpush.msrb.mxu0 %v223_v12  ;;  %306 = vmatpush.msrb.mxu2 %v224_v14  ;;  %v240_v51 = vld [vmem:[#allocation4 + $0x148] sm:$0xff]  ;;  %v237_v55 = vld [vmem:[#allocation4 + $0x130] sm:$0xff]  ;;  %v206_v56 = vld [vmem:[#allocation4 + $0x38] sm:$0xff] }
  0x33   :  { %286 = vmatpush.msrb.mxu1 %v255_v13  ;;  %326 = vmatpush.msrb.mxu3 %v256_v15  ;;  %v238_v57 = vld [vmem:[#allocation4 + $0x138] sm:$0xff]  ;;  %v203_v58 = vld [vmem:[#allocation4 + $0x20] sm:$0xff]  ;;  %v204_v60 = vld [vmem:[#allocation4 + $0x28] sm:$0xff] }
  0x34   :  { %267 = vmatpush.msrb.mxu0 %v221_v16  ;;  %307 = vmatpush.msrb.mxu2 %v222_v18  ;;  %v235_v59 = vld [vmem:[#allocation4 + $0x120] sm:$0xff]  ;;  %v236_v61 = vld [vmem:[#allocation4 + $0x128] sm:$0xff]  ;;  %v201_v62 = vld [vmem:[#allocation4 + $0x10] sm:$0xff] }
  0x35   :  { %287 = vmatpush.msrb.mxu1 %v253_v17  ;;  %327 = vmatpush.msrb.mxu3 %v254_v19  ;;  %v233_v63 = vld [vmem:[#allocation4 + $0x110] sm:$0xff]  ;;  %v202_v0 = vld [vmem:[#allocation4 + $0x18] sm:$0xff]  ;;  %v199_v2 = vld [vmem:[#allocation4] sm:$0xff] }
  0x36   :  { %268 = vmatpush.msrb.mxu0 %v219_v20  ;;  %308 = vmatpush.msrb.mxu2 %v220_v22  ;;  %v234_v1 = vld [vmem:[#allocation4 + $0x118] sm:$0xff]  ;;  %v231_v3 = vld [vmem:[#allocation4 + $0x100] sm:$0xff]  ;;  %v200_v4 = vld [vmem:[#allocation4 + $0x8] sm:$0xff] }
  0x37   :  { %288 = vmatpush.msrb.mxu1 %v251_v21  ;;  %328 = vmatpush.msrb.mxu3 %v252_v23  ;;  %v232_v5 = vld [vmem:[#allocation4 + $0x108] sm:$0xff] }
  0x38   :  { %269 = vmatpush.msrb.mxu0 %v217_v24  ;;  %309 = vmatpush.msrb.mxu2 %v218_v26 }
  0x39   :  { %289 = vmatpush.msrb.mxu1 %v249_v25  ;;  %329 = vmatpush.msrb.mxu3 %v250_v27 }
  0x3a   :  { %270 = vmatpush.msrb.mxu0 %v215_v28  ;;  %310 = vmatpush.msrb.mxu2 %v216_v30 }
  0x3b   :  { %290 = vmatpush.msrb.mxu1 %v247_v29  ;;  %330 = vmatpush.msrb.mxu3 %v248_v31 }
  0x3c   :  { %271 = vmatpush.msrb.mxu0 %v213_v32  ;;  %311 = vmatpush.msrb.mxu2 %v214_v34 }
  0x3d   :  { %291 = vmatpush.msrb.mxu1 %v245_v33  ;;  %331 = vmatpush.msrb.mxu3 %v246_v35 }
  0x3e   :  { %272 = vmatpush.msrb.mxu0 %v211_v36  ;;  %312 = vmatpush.msrb.mxu2 %v212_v38 }
  0x3f   :  { %292 = vmatpush.msrb.mxu1 %v243_v37  ;;  %332 = vmatpush.msrb.mxu3 %v244_v39 }
  0x40   :  { %273 = vmatpush.msrb.mxu0 %v209_v40  ;;  %313 = vmatpush.msrb.mxu2 %v210_v46 }
  0x41   :  { %293 = vmatpush.msrb.mxu1 %v241_v41  ;;  %333 = vmatpush.msrb.mxu3 %v242_v47 }
  0x42   :  { %274 = vmatpush.msrb.mxu0 %v207_v48  ;;  %314 = vmatpush.msrb.mxu2 %v208_v50 }
  0x43   :  { %294 = vmatpush.msrb.mxu1 %v239_v49  ;;  %334 = vmatpush.msrb.mxu3 %v240_v51 }
  0x44   :  { %135 = vmatmul.f32.vlgmr.msra.gmra.mxu0 %v53_v52  ;;  %155 = vmatmul.f32.vlgmr.msra.gmra.mxu1 %v54_v53 }
  0x45   :  { %175 = vmatmul.f32.vlgmr.msra.gmra.mxu2 %v53_v52  ;;  %195 = vmatmul.f32.vlgmr.msra.gmra.mxu3 %v54_v53 }
  0x46   :  { %275 = vmatpush.msrb.mxu0 %v205_v54  ;;  %295 = vmatpush.msrb.mxu1 %v237_v55 }
  0x47   :  { %315 = vmatpush.msrb.mxu2 %v206_v56  ;;  %335 = vmatpush.msrb.mxu3 %v238_v57 }
  0x48   :  { %276 = vmatpush.msrb.mxu0 %v203_v58  ;;  %296 = vmatpush.msrb.mxu1 %v235_v59 }
  0x49   :  { %316 = vmatpush.msrb.mxu2 %v204_v60  ;;  %336 = vmatpush.msrb.mxu3 %v236_v61 }
  0x4a   :  { %277 = vmatpush.msrb.mxu0 %v201_v62  ;;  %297 = vmatpush.msrb.mxu1 %v233_v63 }
  0x4b   :  { %317 = vmatpush.msrb.mxu2 %v202_v0  ;;  %337 = vmatpush.msrb.mxu3 %v234_v1 }
  0x4c   :  { %278 = vmatpush.msrb.mxu0 %v199_v2  ;;  %298 = vmatpush.msrb.mxu1 %v231_v3 }
  0x4d   :  { %318 = vmatpush.msrb.mxu2 %v200_v4  ;;  %338 = vmatpush.msrb.mxu3 %v232_v5 }
  0x4e   :  { %279 = vmatmul.f32.vlgmr.msrb.gmra.mxu0 %v53_v52  ;;  %299 = vmatmul.f32.vlgmr.msrb.gmra.mxu1 %v54_v53 }
  0x4f   :  { %319 = vmatmul.f32.vlgmr.msrb.gmra.mxu2 %v53_v52  ;;  %339 = vmatmul.f32.vlgmr.msrb.gmra.mxu3 %v54_v53 }
  0xc1   :  { %v136_v6 = vpop.f32.mrf.mxu0  ;;  %v156_v7 = vpop.f32.mrf.mxu1 }
  0xc2   :  { %v157_v10 = vadd.f32 %v156_v7, %v136_v6 }
  0xc4   :  { %v343_v14 = vmul.f32 %v157_v10, %v157_v10 }
  0xc8   :  { %v176_v8 = vpop.f32.mrf.mxu2  ;;  %v196_v9 = vpop.f32.mrf.mxu3 }
  0xc9   :  { %v197_v17 = vadd.f32 %v196_v9, %v176_v8 }
  0xcb   :  { %v280_v11 = vpop.f32.mrf.mxu0  ;;  %v300_v12 = vpop.f32.mrf.mxu1  ;;  %v344_v21 = vmul.f32 %v197_v17, %v197_v17 }
  0xcc   :  { %v301_v13 = vadd.f32 %v300_v12, %v280_v11 }
  0xce   :  { %v345_v15 = vmul.f32 %v301_v13, %v301_v13 }
  0xd0   :  { %v347_v16 = vadd.f32 %v345_v15, %v343_v14 }
  0xd2   :  { %387 = vrsqrt.f32 %v347_v16  ;;  %v320_v18 = vpop.f32.mrf.mxu2  ;;  %v340_v19 = vpop.f32.mrf.mxu3  ;;  %vm356_vm0 = vcmp.eq.f32.partialorder %v347_v16, inf  ;;  %v359_v34 = vand.u32 2147483648, %v347_v16  ;;  %vm358_vm1 = vcmp.eq.f32.partialorder %v347_v16, 0.0 }
  0xd3   :  { %v341_v20 = vadd.f32 %v340_v19, %v320_v18 }
  0xd5   :  { %v346_v22 = vmul.f32 %v341_v20, %v341_v20 }
  0xd7   :  { %v348_v23 = vadd.f32 %v346_v22, %v344_v21 }
  0xd8   :  { %v388_v24 = vpop.eup %387 }
  0xd9   :  { %v350_v25 = vmul.f32 %v388_v24, %v347_v16  ;;  %389 = vrsqrt.f32 %v348_v23  ;;  %vm368_vm2 = vcmp.eq.f32.partialorder %v348_v23, inf  ;;  %v371_v41 = vand.u32 2147483648, %v348_v23 }
  0xda   :  { %vm370_vm3 = vcmp.eq.f32.partialorder %v348_v23, 0.0 }
  0xdb   :  { %v351_v26 = vmul.f32 %v388_v24, %v350_v25 }
  0xdd   :  { %v352_v27 = vmul.f32 0.5, %v351_v26 }
  0xdf   :  { %v390_v28 = vpop.eup %389  ;;  %v353_v29 = vsub.f32 1.5, %v352_v27 }
  0xe0   :  { %v362_v30 = vmul.f32 %v390_v28, %v348_v23 }
  0xe1   :  { %v354_v31 = vmul.f32 %v388_v24, %v353_v29 }
  0xe2   :  { %v363_v32 = vmul.f32 %v390_v28, %v362_v30 }
  0xe3   :  { %v355_v33 = vmul.f32 %v354_v31, %v347_v16 }
  0xe4   :  { %v364_v35 = vmul.f32 0.5, %v363_v32 }
  0xe5   :  { %v357_v36 = vsel %vm356_vm0, %v347_v16, %v355_v33 }
  0xe6   :  { %v360_v37 = vsel %vm358_vm1, %v359_v34, %v357_v36  ;;  %v365_v38 = vsub.f32 1.5, %v364_v35 }
  0xe7   :  { %375 = vst [vmem:[%s500_s4] sm:$0xff] %v360_v37 }
  0xe8   :  { %v366_v39 = vmul.f32 %v390_v28, %v365_v38 }
  0xea   :  { %v367_v40 = vmul.f32 %v366_v39, %v348_v23 }
  0xec   :  { %v369_v42 = vsel %vm368_vm2, %v348_v23, %v367_v40 }
  0xed   :  { %v372_v43 = vsel %vm370_vm3, %v371_v41, %v369_v42 }
  0xee   :  { %376 = vst [vmem:[%s500_s4 + $0x8] sm:$0xff] %v372_v43 }
  0xef   :  { %381 = vsyncpa [#allocation3], 1 }
  0xf0   :  { %382 = vsyncpa [#allocation5], 1 }

</bundles_post_ra>
